<compile_context>
chip_gen: v5e
topology: v5e:2x2
jax: 0.10.0
libtpu: 0.0.40
codegen_flags: <defaults>
</compile_context>

<pallas_src>
import functools
import numpy as np
import jax
import jax.numpy as jnp
from jax import lax
from jax.experimental import pallas as pl
from jax.experimental.pallas import tpu as pltpu


# ---------------------------------------------------------------------------
# Tiling helper
# ---------------------------------------------------------------------------

def _pick_lane_tile(m, rows, bytes_per_elem=4, vmem_budget=6 * 1024 * 1024):
    """Largest lane tile (multiple of 128 that divides m) whose double-buffered
    blocks (`rows` sublane rows per lane column) fit a conservative VMEM budget.
    Budget is chosen to be safe on v7x (64 MiB physical / 32 MiB scoped default);
    v5e/v6e have 2x headroom.  Falls back to a single full-extent block (always a
    legal BlockSpec), which also handles m not divisible by 128."""
    cap = vmem_budget // (2 * bytes_per_elem * max(int(rows), 1))
    for t in (2048, 1024, 512, 256, 128):
        if t <= cap and m % t == 0:
            return t
    return m


# ---------------------------------------------------------------------------
# Pallas kernels
# ---------------------------------------------------------------------------

def _down_up_kernel(wd_ref, wu_ref, p_ref, o_ref, *, neg_slope, compute_dtype):
    """Fused LeakyReLU -> down-conv matmul -> ReLU -> transposed-conv contribution
    matmul.  Everything is channels-major: the lane (last) dim is the flattened
    spatial index, so MXU columns and output stores are lane-dense.

    NOTE: folding the activation into the patch matrix relies on act(0) == 0 so the
    zero padding entries stay zero (true for LeakyReLU/ReLU; would break if a conv
    bias preceded the activation)."""
    p = p_ref[...]
    p = jnp.where(p > 0, p, neg_slope * p)                       # LeakyReLU(0.2)
    d = jnp.dot(wd_ref[...].astype(compute_dtype), p.astype(compute_dtype),
                preferred_element_type=jnp.float32)              # (inner_nc, tm)
    d = jnp.maximum(d, 0.0)                                      # ReLU
    o_ref[...] = jnp.dot(wu_ref[...].astype(compute_dtype), d.astype(compute_dtype),
                         preferred_element_type=jnp.float32)     # (16*outer_nc, tm)


def down_up(w_down_mat, w_up_mat, patches, compute_dtype=jnp.float32):
    """w_down_mat: (inner_nc, 16*Cin); w_up_mat: (16*outer_nc, inner_nc);
    patches: (16*Cin, M) channels-major im2col  ->  (16*outer_nc, M) contributions."""
    inner_nc, kd = w_down_mat.shape
    co16, _ = w_up_mat.shape
    _, m = patches.shape
    tm = _pick_lane_tile(m, kd + co16 + inner_nc)
    kernel = functools.partial(_down_up_kernel, neg_slope=0.2,
                               compute_dtype=compute_dtype)
    return pl.pallas_call(
        kernel,
        out_shape=jax.ShapeDtypeStruct((co16, m), jnp.float32),
        grid_spec=pltpu.PrefetchScalarGridSpec(
            num_scalar_prefetch=0,
            grid=(m // tm,),
            in_specs=[pl.BlockSpec((inner_nc, kd), lambda i: (0, 0)),   # resident weight
                      pl.BlockSpec((co16, inner_nc), lambda i: (0, 0)),  # resident weight
                      pl.BlockSpec((kd, tm), lambda i: (0, i))],
            out_specs=pl.BlockSpec((co16, tm), lambda i: (0, i)),
        ),
        compiler_params=pltpu.CompilerParams(dimension_semantics=("parallel",)),
    )(w_down_mat, w_up_mat, patches)


def _bn_stats_kernel(y_ref, sum_ref, sq_ref):
    # Accumulate per-channel sum / sum-of-squares across the whole grid (P3 pattern).
    @pl.when(pl.program_id(0) + pl.program_id(1) == 0)
    def _():
        sum_ref[...] = jnp.zeros_like(sum_ref)
        sq_ref[...] = jnp.zeros_like(sq_ref)
    y = y_ref[...]                                    # (1, C, tm)
    sum_ref[...] += jnp.sum(y, axis=2, keepdims=True)
    sq_ref[...] += jnp.sum(y * y, axis=2, keepdims=True)


def bn_stats(y3):
    n, c, l = y3.shape
    tm = _pick_lane_tile(l, c)
    return pl.pallas_call(
        _bn_stats_kernel,
        out_shape=[jax.ShapeDtypeStruct((1, c, 1), jnp.float32),
                   jax.ShapeDtypeStruct((1, c, 1), jnp.float32)],
        grid_spec=pltpu.PrefetchScalarGridSpec(
            num_scalar_prefetch=0,
            grid=(n, l // tm),
            in_specs=[pl.BlockSpec((1, c, tm), lambda b, i: (b, 0, i))],
            out_specs=[pl.BlockSpec((1, c, 1), lambda b, i: (0, 0, 0)),
                       pl.BlockSpec((1, c, 1), lambda b, i: (0, 0, 0))],
        ),
        compiler_params=pltpu.CompilerParams(
            dimension_semantics=("arbitrary", "arbitrary")),
    )(y3)


def _bn_norm_kernel(y_ref, scale_ref, bias_ref, o_ref):
    # Per-channel affine (scale/bias already fold mean/var/gamma/beta).
    o_ref[...] = y_ref[...] * scale_ref[...] + bias_ref[...]


def bn_normalize(y3, scale, bias):
    n, c, l = y3.shape
    tm = _pick_lane_tile(l, 2 * c)
    return pl.pallas_call(
        _bn_norm_kernel,
        out_shape=jax.ShapeDtypeStruct((n, c, l), jnp.float32),
        grid_spec=pltpu.PrefetchScalarGridSpec(
            num_scalar_prefetch=0,
            grid=(n, l // tm),
            in_specs=[pl.BlockSpec((1, c, tm), lambda b, i: (b, 0, i)),
                      pl.BlockSpec((1, c, 1), lambda b, i: (0, 0, 0)),
                      pl.BlockSpec((1, c, 1), lambda b, i: (0, 0, 0))],
            out_specs=pl.BlockSpec((1, c, tm), lambda b, i: (b, 0, i)),
        ),
        compiler_params=pltpu.CompilerParams(
            dimension_semantics=("parallel", "parallel")),
    )(y3, scale, bias)


# ---------------------------------------------------------------------------
# Glue: channels-major im2col (down conv) and overlap-add (transposed conv)
# ---------------------------------------------------------------------------

def _im2col_down_cm(x_nchw, ho, wo):
    """im2col for Conv2d(k=4, s=2, p=1), channels-major.
    Returns (Cin*16, N*Ho*Wo); row order (ci, kh, kw) matches the plain OIHW reshape
    of the conv weight, column order is (n, ho, wo)."""
    n, c, h, w = x_nchw.shape
    xp = jnp.pad(x_nchw, ((0, 0), (0, 0), (1, 1), (1, 1)))
    cols = [xp[:, :, kh:kh + 2 * ho:2, kw:kw + 2 * wo:2]       # (N, C, Ho, Wo)
            for kh in range(4) for kw in range(4)]
    p = jnp.stack(cols, axis=2)                                 # (N, C, 16, Ho, Wo)
    p = jnp.transpose(p, (1, 2, 0, 3, 4))                       # (C, 16, N, Ho, Wo)
    return p.reshape(c * 16, n * ho * wo)
    # TODO(synk): move this patch extraction into the Pallas kernel (halo'd tile DMA +
    # strided ref slices) to avoid materializing the 16x patch matrix in HBM.


def _shift(a, d, axis):
    """result[i] = a[i + d] along `axis`, zero where i + d is out of range."""
    if d == 0:
        return a
    length = a.shape[axis]
    idx = [slice(None)] * a.ndim
    pad = [(0, 0)] * a.ndim
    if d > 0:
        idx[axis] = slice(d, None)
        pad[axis] = (0, d)
    else:
        idx[axis] = slice(None, length + d)
        pad[axis] = (-d, 0)
    return jnp.pad(a[tuple(idx)], pad)


def _overlap_add_s2k4(contrib, n, ho, wo, outer_nc):
    """col2im for ConvTranspose2d(k=4, s=2, p=1):
      out[:, co, 2*ih-1+kh, 2*iw-1+kw] += contrib[(co,kh,kw), (n,ih,iw)]
    with out-of-range targets dropped.  Since k == 2*stride, every output pixel gets
    exactly 2x2 taps -> 4 parity phases, interleaved back to (N, outer_nc, 2Ho, 2Wo)."""
    p6 = contrib.reshape(outer_nc, 4, 4, n, ho, wo)
    phases = []
    for r in (0, 1):
        row = []
        for s in (0, 1):
            acc = jnp.zeros((outer_nc, n, ho, wo), contrib.dtype)
            for kh in range(4):
                if (r + 1 - kh) % 2:
                    continue
                dh = (r + 1 - kh) // 2
                for kw in range(4):
                    if (s + 1 - kw) % 2:
                        continue
                    dw = (s + 1 - kw) // 2
                    acc = acc + _shift(_shift(p6[:, kh, kw], dh, 2), dw, 3)
            row.append(acc)
        phases.append(jnp.stack(row, axis=0))
    y = jnp.stack(phases, axis=0)                     # (2r, 2s, C, N, Ho, Wo)
    y = jnp.transpose(y, (3, 2, 4, 0, 5, 1))          # (N, C, Ho, r, Wo, s)
    return y.reshape(n, outer_nc, 2 * ho, 2 * wo)
    # TODO(synk): this overlap-add could be folded into a Pallas kernel (halo handling)
    # so the (16*outer_nc, M) contribution tensor never round-trips through HBM.


# ---------------------------------------------------------------------------
# Forward pass (innermost UnetSkipConnectionBlock; BatchNorm => conv bias=False)
# ---------------------------------------------------------------------------

def unet_innermost_block(x_nchw, params, compute_dtype=jnp.float32):
    """cat([x, BN(ConvT_{4,2,1}(ReLU(Conv_{4,2,1}(LeakyReLU_{0.2}(x)))))], dim=1).
    Set compute_dtype=jnp.bfloat16 on v6e/v7x for 2x MXU rate (f32 accumulation);
    kept f32 here so the strict numerical check against the reference passes."""
    n, cin, h, w = x_nchw.shape
    x = x_nchw.astype(jnp.float32)
    ho = (h + 2 - 4) // 2 + 1
    wo = (w + 2 - 4) // 2 + 1

    w_down = params['w_down']                      # (inner_nc, Cin, 4, 4)  OIHW
    w_up = params['w_up']                          # (inner_nc, outer_nc, 4, 4)
    inner_nc = w_down.shape[0]
    outer_nc = w_up.shape[1]

    # Channels-major patches + (O, K) weights (down weight: plain OIHW reshape).
    patches = _im2col_down_cm(x, ho, wo)                           # (Cin*16, M)
    w_down_mat = w_down.reshape(inner_nc, cin * 16)
    w_up_mat = jnp.transpose(w_up, (1, 2, 3, 0)).reshape(outer_nc * 16, inner_nc)

    # Fused Pallas kernel: LeakyReLU + down conv + ReLU + transposed-conv contributions.
    contrib = down_up(w_down_mat, w_up_mat, patches, compute_dtype)  # (outer_nc*16, M)

    # Overlap-add -> transposed-conv output, already in batch-major (N, C, H, W).
    y = _overlap_add_s2k4(contrib, n, ho, wo, outer_nc)
    h_out, w_out = 2 * ho, 2 * wo
    y3 = y.reshape(n, outer_nc, h_out * w_out)

    # BatchNorm2d(outer_nc), training-mode biased batch statistics (tiled Pallas).
    ssum, ssq = bn_stats(y3)                                       # each (1, C, 1)
    cnt = jnp.float32(n * h_out * w_out)
    mean = ssum / cnt
    var = ssq / cnt - mean * mean
    scale = params['gamma'].reshape(1, -1, 1) * lax.rsqrt(var + 1e-5)
    bias = params['beta'].reshape(1, -1, 1) - mean * scale
    y_norm = bn_normalize(y3, scale, bias)                         # (N, C, H*W)
    # TODO(synk): running_mean/running_var buffer updates are PyTorch training-side
    # state and do not affect the forward output; not reproduced here.

    # Skip connection: torch.cat([x, model(x)], dim=1) — layouts line up, no transpose.
    out = jnp.concatenate([x.reshape(n, cin, h * w), y_norm], axis=1)
    return out.reshape(n, cin + outer_nc, h, w)


# ---------------------------------------------------------------------------
# Pure-JAX reference (for correctness check)
# ---------------------------------------------------------------------------

def reference(x_nchw, params):
    x = x_nchw.astype(jnp.float32)
    xa = jnp.where(x > 0, x, 0.2 * x)
    d = lax.conv_general_dilated(xa, params['w_down'], (2, 2), [(1, 1), (1, 1)],
                                 dimension_numbers=('NCHW', 'OIHW', 'NCHW'))
    da = jnp.maximum(d, 0.0)
    w_eq = params['w_up'][:, :, ::-1, ::-1].transpose(1, 0, 2, 3)   # (outer, inner, 4, 4)
    u = lax.conv_general_dilated(da, w_eq, (1, 1), [(2, 2), (2, 2)],
                                 lhs_dilation=(2, 2),
                                 dimension_numbers=('NCHW', 'OIHW', 'NCHW'))
    mean = jnp.mean(u, axis=(0, 2, 3), keepdims=True)
    var = jnp.mean(jnp.square(u - mean), axis=(0, 2, 3), keepdims=True)
    y = ((u - mean) * lax.rsqrt(var + 1e-5)
         * params['gamma'].reshape(1, -1, 1, 1) + params['beta'].reshape(1, -1, 1, 1))
    return jnp.concatenate([x, y], axis=1)


# ---------------------------------------------------------------------------
# Main
# ---------------------------------------------------------------------------

if __name__ == "__main__":
    key = jax.random.PRNGKey(0)
    k1, k2, k3, k4, k5 = jax.random.split(key, 5)

    N, H, W = 2, 16, 16
    outer_nc = 4            # input_nc defaults to outer_nc
    input_nc = outer_nc
    inner_nc = 8

    x = jax.random.normal(k1, (N, input_nc, H, W), jnp.float32)
    params = {
        # Conv2d(input_nc, inner_nc, 4, 2, 1, bias=False): weight (O, I, kH, kW)
        'w_down': 0.02 * jax.random.normal(k2, (inner_nc, input_nc, 4, 4), jnp.float32),
        # ConvTranspose2d(inner_nc, outer_nc, 4, 2, 1, bias=False): weight (I, O, kH, kW)
        'w_up': 0.02 * jax.random.normal(k3, (inner_nc, outer_nc, 4, 4), jnp.float32),
        # BatchNorm2d(outer_nc) affine params
        'gamma': 1.0 + 0.1 * jax.random.normal(k4, (outer_nc,), jnp.float32),
        'beta': 0.1 * jax.random.normal(k5, (outer_nc,), jnp.float32),
    }

    out = jax.jit(unet_innermost_block)(x, params)
    out = jax.block_until_ready(out)

    assert out.shape == (N, input_nc + outer_nc, H, W), out.shape
    ref = reference(x, params)
    np.testing.assert_allclose(np.asarray(out), np.asarray(ref), rtol=1e-4, atol=1e-4)

    print("KERNEL_OK")
</pallas_src>

<mosaic_0001>
module attributes {stable_mosaic.version = 11 : i64} {
  func.func @_down_up_kernel(%arg0: i32, %arg1: memref<8x64xf32, #tpu.memory_space<vmem>>, %arg2: memref<64x8xf32, #tpu.memory_space<vmem>>, %arg3: memref<64x128xf32, #tpu.memory_space<vmem>>, %arg4: memref<64x128xf32, #tpu.memory_space<vmem>>) attributes {dimension_semantics = [#tpu.dimension_semantics<parallel>], iteration_bounds = array<i64: 1>, scalar_prefetch = 0 : i64, scratch_operands = 0 : i64, tpu.core_type = #tpu.core_type<tc>, window_params = [{pipeline_mode = #tpu.pipeline_mode<synchronous>, transform_indices = @transform_0, window_bounds = array<i64: 8, 64>}, {pipeline_mode = #tpu.pipeline_mode<synchronous>, transform_indices = @transform_1, window_bounds = array<i64: 64, 8>}, {transform_indices = @transform_2, window_bounds = array<i64: 64, 128>}, {transform_indices = @transform_3, window_bounds = array<i64: 64, 128>}]} {
    %c0 = arith.constant 0 : index
    %c0_0 = arith.constant 0 : index
    %0 = vector.load %arg3[%c0, %c0_0] : memref<64x128xf32, #tpu.memory_space<vmem>>, vector<64x128xf32>
    %cst = arith.constant 0.000000e+00 : f32
    %1 = vector.broadcast %cst : f32 to vector<64x128xf32>
    %2 = arith.cmpf ogt, %0, %1 : vector<64x128xf32>
    %cst_1 = arith.constant 2.000000e-01 : f32
    %3 = vector.broadcast %cst_1 : f32 to vector<64x128xf32>
    %4 = arith.mulf %3, %0 : vector<64x128xf32>
    %5 = arith.select %2, %0, %4 : vector<64x128xi1>, vector<64x128xf32>
    %c0_2 = arith.constant 0 : index
    %c0_3 = arith.constant 0 : index
    %6 = vector.load %arg1[%c0_2, %c0_3] : memref<8x64xf32, #tpu.memory_space<vmem>>, vector<8x64xf32>
    %cst_4 = arith.constant dense<0.000000e+00> : vector<8x128xf32>
    %7 = tpu.matmul %6, %5, %cst_4 {dimension_numbers = #tpu.dot_dimension_numbers<[1], [0], [0], [1], [0, 0, 1, 1], [], []>} : vector<8x64xf32>, vector<64x128xf32>, vector<8x128xf32> -> vector<8x128xf32>
    %cst_5 = arith.constant 0.000000e+00 : f32
    %8 = vector.broadcast %cst_5 : f32 to vector<8x128xf32>
    %9 = arith.maximumf %7, %8 : vector<8x128xf32>
    %c0_6 = arith.constant 0 : index
    %c0_7 = arith.constant 0 : index
    %10 = vector.load %arg2[%c0_6, %c0_7] : memref<64x8xf32, #tpu.memory_space<vmem>>, vector<64x8xf32>
    %cst_8 = arith.constant dense<0.000000e+00> : vector<64x128xf32>
    %11 = tpu.matmul %10, %9, %cst_8 {dimension_numbers = #tpu.dot_dimension_numbers<[1], [0], [0], [1], [0, 0, 1, 1], [], []>} : vector<64x8xf32>, vector<8x128xf32>, vector<64x128xf32> -> vector<64x128xf32>
    %c0_9 = arith.constant 0 : index
    %c0_10 = arith.constant 0 : index
    %12 = vector.load %arg4[%c0_9, %c0_10] : memref<64x128xf32, #tpu.memory_space<vmem>>, vector<64x128xf32>
    tpu.vector_store %arg4[%c0_9, %c0_10], %11 {strides = array<i32>} : memref<64x128xf32, #tpu.memory_space<vmem>>, vector<64x128xf32>,
    return
  }
  func.func @transform_0(%arg0: i32) -> (i32, i32) {
    %c0_i32 = arith.constant 0 : i32
    %c0_i32_0 = arith.constant 0 : i32
    %c0_i32_1 = arith.constant 0 : i32
    return %c0_i32, %c0_i32_0 : i32, i32
  }
  func.func @transform_1(%arg0: i32) -> (i32, i32) {
    %c0_i32 = arith.constant 0 : i32
    %c0_i32_0 = arith.constant 0 : i32
    %c0_i32_1 = arith.constant 0 : i32
    return %c0_i32, %c0_i32_0 : i32, i32
  }
  func.func @transform_2(%arg0: i32) -> (i32, i32) {
    %c0_i32 = arith.constant 0 : i32
    %c0_i32_0 = arith.constant 0 : i32
    return %c0_i32, %arg0 : i32, i32
  }
  func.func @transform_3(%arg0: i32) -> (i32, i32) {
    %c0_i32 = arith.constant 0 : i32
    %c0_i32_0 = arith.constant 0 : i32
    return %c0_i32, %arg0 : i32, i32
  }
}

module attributes {stable_mosaic.version = 11 : i64} {
  func.func @_bn_stats_kernel(%arg0: i32, %arg1: i32, %arg2: memref<1x4x256xf32, #tpu.memory_space<vmem>>, %arg3: memref<1x4x1xf32, #tpu.memory_space<vmem>>, %arg4: memref<1x4x1xf32, #tpu.memory_space<vmem>>) attributes {dimension_semantics = [#tpu.dimension_semantics<arbitrary>, #tpu.dimension_semantics<arbitrary>], iteration_bounds = array<i64: 2, 1>, scalar_prefetch = 0 : i64, scratch_operands = 0 : i64, tpu.core_type = #tpu.core_type<tc>, window_params = [{transform_indices = @transform_0, window_bounds = array<i64: 1, 4, 256>}, {pipeline_mode = #tpu.pipeline_mode<synchronous>, transform_indices = @transform_1, window_bounds = array<i64: 1, 4, 1>}, {pipeline_mode = #tpu.pipeline_mode<synchronous>, transform_indices = @transform_2, window_bounds = array<i64: 1, 4, 1>}]} {
    %0 = arith.addi %arg0, %arg1 : i32
    %c0_i32 = arith.constant 0 : i32
    %1 = arith.cmpi eq, %0, %c0_i32 : i32
    %2 = arith.extui %1 : i1 to i32
    %c0_i32_0 = arith.constant 0 : i32
    %3 = arith.cmpi ne, %2, %c0_i32_0 : i32
    scf.if %3 {
      %cst_16 = arith.constant 0.000000e+00 : f32
      %16 = vector.broadcast %cst_16 : f32 to vector<1x4x1xf32>
      %c0_17 = arith.constant 0 : index
      %c0_18 = arith.constant 0 : index
      %c0_19 = arith.constant 0 : index
      %17 = vector.load %arg3[%c0_17, %c0_18, %c0_19] : memref<1x4x1xf32, #tpu.memory_space<vmem>>, vector<1x4x1xf32>
      tpu.vector_store %arg3[%c0_17, %c0_18, %c0_19], %16 {strides = array<i32>} : memref<1x4x1xf32, #tpu.memory_space<vmem>>, vector<1x4x1xf32>,
      %cst_20 = arith.constant 0.000000e+00 : f32
      %18 = vector.broadcast %cst_20 : f32 to vector<1x4x1xf32>
      %c0_21 = arith.constant 0 : index
      %c0_22 = arith.constant 0 : index
      %c0_23 = arith.constant 0 : index
      %19 = vector.load %arg4[%c0_21, %c0_22, %c0_23] : memref<1x4x1xf32, #tpu.memory_space<vmem>>, vector<1x4x1xf32>
      tpu.vector_store %arg4[%c0_21, %c0_22, %c0_23], %18 {strides = array<i32>} : memref<1x4x1xf32, #tpu.memory_space<vmem>>, vector<1x4x1xf32>,
    } else {
    }
    %c0 = arith.constant 0 : index
    %c0_1 = arith.constant 0 : index
    %c0_2 = arith.constant 0 : index
    %4 = vector.load %arg2[%c0, %c0_1, %c0_2] : memref<1x4x256xf32, #tpu.memory_space<vmem>>, vector<1x4x256xf32>
    %c0_3 = arith.constant 0 : index
    %c0_4 = arith.constant 0 : index
    %c0_5 = arith.constant 0 : index
    %5 = vector.load %arg3[%c0_3, %c0_4, %c0_5] : memref<1x4x1xf32, #tpu.memory_space<vmem>>, vector<1x4x1xf32>
    %cst = arith.constant dense<0.000000e+00> : vector<1x4xf32>
    %6 = vector.multi_reduction <add>, %4, %cst [2] : vector<1x4x256xf32> to vector<1x4xf32>
    %7 = vector.shape_cast %6 : vector<1x4xf32> to vector<1x4x1xf32>
    %8 = arith.addf %5, %7 : vector<1x4x1xf32>
    %c0_6 = arith.constant 0 : index
    %c0_7 = arith.constant 0 : index
    %c0_8 = arith.constant 0 : index
    %9 = vector.load %arg3[%c0_6, %c0_7, %c0_8] : memref<1x4x1xf32, #tpu.memory_space<vmem>>, vector<1x4x1xf32>
    tpu.vector_store %arg3[%c0_6, %c0_7, %c0_8], %8 {strides = array<i32>} : memref<1x4x1xf32, #tpu.memory_space<vmem>>, vector<1x4x1xf32>,
    %c0_9 = arith.constant 0 : index
    %c0_10 = arith.constant 0 : index
    %c0_11 = arith.constant 0 : index
    %10 = vector.load %arg4[%c0_9, %c0_10, %c0_11] : memref<1x4x1xf32, #tpu.memory_space<vmem>>, vector<1x4x1xf32>
    %11 = arith.mulf %4, %4 : vector<1x4x256xf32>
    %cst_12 = arith.constant dense<0.000000e+00> : vector<1x4xf32>
    %12 = vector.multi_reduction <add>, %11, %cst_12 [2] : vector<1x4x256xf32> to vector<1x4xf32>
    %13 = vector.shape_cast %12 : vector<1x4xf32> to vector<1x4x1xf32>
    %14 = arith.addf %10, %13 : vector<1x4x1xf32>
    %c0_13 = arith.constant 0 : index
    %c0_14 = arith.constant 0 : index
    %c0_15 = arith.constant 0 : index
    %15 = vector.load %arg4[%c0_13, %c0_14, %c0_15] : memref<1x4x1xf32, #tpu.memory_space<vmem>>, vector<1x4x1xf32>
    tpu.vector_store %arg4[%c0_13, %c0_14, %c0_15], %14 {strides = array<i32>} : memref<1x4x1xf32, #tpu.memory_space<vmem>>, vector<1x4x1xf32>,
    return
  }
  func.func @transform_0(%arg0: i32, %arg1: i32) -> (i32, i32, i32) {
    %c0_i32 = arith.constant 0 : i32
    %c0_i32_0 = arith.constant 0 : i32
    return %arg0, %c0_i32, %arg1 : i32, i32, i32
  }
  func.func @transform_1(%arg0: i32, %arg1: i32) -> (i32, i32, i32) {
    %c0_i32 = arith.constant 0 : i32
    %c0_i32_0 = arith.constant 0 : i32
    %c0_i32_1 = arith.constant 0 : i32
    %c0_i32_2 = arith.constant 0 : i32
    return %c0_i32, %c0_i32_0, %c0_i32_1 : i32, i32, i32
  }
  func.func @transform_2(%arg0: i32, %arg1: i32) -> (i32, i32, i32) {
    %c0_i32 = arith.constant 0 : i32
    %c0_i32_0 = arith.constant 0 : i32
    %c0_i32_1 = arith.constant 0 : i32
    %c0_i32_2 = arith.constant 0 : i32
    return %c0_i32, %c0_i32_0, %c0_i32_1 : i32, i32, i32
  }
}

module attributes {stable_mosaic.version = 11 : i64} {
  func.func @_bn_norm_kernel(%arg0: i32, %arg1: i32, %arg2: memref<1x4x256xf32, #tpu.memory_space<vmem>>, %arg3: memref<1x4x1xf32, #tpu.memory_space<vmem>>, %arg4: memref<1x4x1xf32, #tpu.memory_space<vmem>>, %arg5: memref<1x4x256xf32, #tpu.memory_space<vmem>>) attributes {dimension_semantics = [#tpu.dimension_semantics<parallel>, #tpu.dimension_semantics<parallel>], iteration_bounds = array<i64: 2, 1>, scalar_prefetch = 0 : i64, scratch_operands = 0 : i64, tpu.core_type = #tpu.core_type<tc>, window_params = [{transform_indices = @transform_0, window_bounds = array<i64: 1, 4, 256>}, {pipeline_mode = #tpu.pipeline_mode<synchronous>, transform_indices = @transform_1, window_bounds = array<i64: 1, 4, 1>}, {pipeline_mode = #tpu.pipeline_mode<synchronous>, transform_indices = @transform_2, window_bounds = array<i64: 1, 4, 1>}, {transform_indices = @transform_3, window_bounds = array<i64: 1, 4, 256>}]} {
    %c0 = arith.constant 0 : index
    %c0_0 = arith.constant 0 : index
    %c0_1 = arith.constant 0 : index
    %0 = vector.load %arg2[%c0, %c0_0, %c0_1] : memref<1x4x256xf32, #tpu.memory_space<vmem>>, vector<1x4x256xf32>
    %c0_2 = arith.constant 0 : index
    %c0_3 = arith.constant 0 : index
    %c0_4 = arith.constant 0 : index
    %1 = vector.load %arg3[%c0_2, %c0_3, %c0_4] : memref<1x4x1xf32, #tpu.memory_space<vmem>>, vector<1x4x1xf32>
    %2 = vector.broadcast %1 : vector<1x4x1xf32> to vector<1x4x256xf32>
    %3 = arith.mulf %0, %2 : vector<1x4x256xf32>
    %c0_5 = arith.constant 0 : index
    %c0_6 = arith.constant 0 : index
    %c0_7 = arith.constant 0 : index
    %4 = vector.load %arg4[%c0_5, %c0_6, %c0_7] : memref<1x4x1xf32, #tpu.memory_space<vmem>>, vector<1x4x1xf32>
    %5 = vector.broadcast %4 : vector<1x4x1xf32> to vector<1x4x256xf32>
    %6 = arith.addf %3, %5 : vector<1x4x256xf32>
    %c0_8 = arith.constant 0 : index
    %c0_9 = arith.constant 0 : index
    %c0_10 = arith.constant 0 : index
    %7 = vector.load %arg5[%c0_8, %c0_9, %c0_10] : memref<1x4x256xf32, #tpu.memory_space<vmem>>, vector<1x4x256xf32>
    tpu.vector_store %arg5[%c0_8, %c0_9, %c0_10], %6 {strides = array<i32>} : memref<1x4x256xf32, #tpu.memory_space<vmem>>, vector<1x4x256xf32>,
    return
  }
  func.func @transform_0(%arg0: i32, %arg1: i32) -> (i32, i32, i32) {
    %c0_i32 = arith.constant 0 : i32
    %c0_i32_0 = arith.constant 0 : i32
    return %arg0, %c0_i32, %arg1 : i32, i32, i32
  }
  func.func @transform_1(%arg0: i32, %arg1: i32) -> (i32, i32, i32) {
    %c0_i32 = arith.constant 0 : i32
    %c0_i32_0 = arith.constant 0 : i32
    %c0_i32_1 = arith.constant 0 : i32
    %c0_i32_2 = arith.constant 0 : i32
    return %c0_i32, %c0_i32_0, %c0_i32_1 : i32, i32, i32
  }
  func.func @transform_2(%arg0: i32, %arg1: i32) -> (i32, i32, i32) {
    %c0_i32 = arith.constant 0 : i32
    %c0_i32_0 = arith.constant 0 : i32
    %c0_i32_1 = arith.constant 0 : i32
    %c0_i32_2 = arith.constant 0 : i32
    return %c0_i32, %c0_i32_0, %c0_i32_1 : i32, i32, i32
  }
  func.func @transform_3(%arg0: i32, %arg1: i32) -> (i32, i32, i32) {
    %c0_i32 = arith.constant 0 : i32
    %c0_i32_0 = arith.constant 0 : i32
    return %arg0, %c0_i32, %arg1 : i32, i32, i32
  }
}

</mosaic_0001>

<bundles_post_ra>
// kernel: unet_innermost_block.3
= control target key start
LH: loop header
LB: loop body
LE: loop exit
PB: predicated region body
PF: predicated region fallthrough
CT: control target
= control target key end

     0   :  { %vm47_vm8 = vcmask 523264   ;;  %vm80_vm9 = vcmask 64512   ;;  %s272_s2 = inlined_call_operand.vmem [shape: f32[64,128], index: 2, kind: input, shape index: {}]   ;;  %s273_s0 = inlined_call_operand.vmem [shape: f32[8,64], index: 0, kind: input, shape index: {}]   ;;  %s274_s1 = inlined_call_operand.vmem [shape: f32[64,8], index: 1, kind: input, shape index: {}]   ;;  %s275_s3 = inlined_call_operand.vmem [shape: f32[64,128], index: 3, kind: output, shape index: {}]  }
   0x1   :  { %v21_v0 = vld [vmem:[%s272_s2 + $0x38] sm:$0xff]  ;;  %v20_v1 = vld [vmem:[%s272_s2 + $0x30] sm:$0xff]  ;;  %v19_v2 = vld [vmem:[%s272_s2 + $0x28] sm:$0xff] }
   0x2   :  { %vm29_vm0 = vcmp.gt.f32.partialorder %v21_v0, 0.0  ;;  %v37_v3 = vmul.f32 0.2, %v21_v0  ;;  %vm28_vm1 = vcmp.gt.f32.partialorder %v20_v1, 0.0  ;;  %v36_v4 = vmul.f32 0.2, %v20_v1 }
   0x3   :  { %vm27_vm2 = vcmp.gt.f32.partialorder %v19_v2, 0.0  ;;  %v35_v5 = vmul.f32 0.2, %v19_v2  ;;  %v18_v6 = vld [vmem:[%s272_s2 + $0x20] sm:$0xff]  ;;  %v17_v7 = vld [vmem:[%s272_s2 + $0x18] sm:$0xff]  ;;  %v16_v11 = vld [vmem:[%s272_s2 + $0x10] sm:$0xff] }
   0x4   :  { %v45_v8 = vsel %vm29_vm0, %v21_v0, %v37_v3  ;;  %v44_v9 = vsel %vm28_vm1, %v20_v1, %v36_v4  ;;  %v34_v10 = vmul.f32 0.2, %v18_v6  ;;  %vm26_vm3 = vcmp.gt.f32.partialorder %v18_v6, 0.0  ;;  %v15_v14 = vld [vmem:[%s272_s2 + $0x8] sm:$0xff]  ;;  %v14_v17 = vld [vmem:[%s272_s2] sm:$0xff]  ;;  %v75_v27 = vld [vmem:[%s274_s1 + $0x18] sm:$0xff] }
   0x5   :  { %59 = vmatpush.msra.mxu0 %v45_v8  ;;  %v43_v12 = vsel %vm27_vm2, %v19_v2, %v35_v5  ;;  %v33_v13 = vmul.f32 0.2, %v17_v7  ;;  %vm25_vm4 = vcmp.gt.f32.partialorder %v17_v7, 0.0  ;;  %v32_v16 = vmul.f32 0.2, %v16_v11  ;;  %v46_v24 = vld [vmem:[%s273_s0] sm:$0xff] }
   0x6   :  { %v42_v15 = vsel %vm26_vm3, %v18_v6, %v34_v10  ;;  %vm24_vm5 = vcmp.gt.f32.partialorder %v16_v11, 0.0  ;;  %v31_v19 = vmul.f32 0.2, %v15_v14  ;;  %vm23_vm6 = vcmp.gt.f32.partialorder %v15_v14, 0.0  ;;  %v72_v28 = vld [vmem:[%s274_s1] sm:$0xff]  ;;  %v78_v29 = vld [vmem:[%s274_s1 + $0x30] sm:$0xff] }
   0x7   :  { %60 = vmatpush.msra.mxu0 %v44_v9  ;;  %v41_v18 = vsel %vm25_vm4, %v17_v7, %v33_v13  ;;  %v40_v20 = vsel %vm24_vm5, %v16_v11, %v32_v16  ;;  %v30_v21 = vmul.f32 0.2, %v14_v17  ;;  %vm22_vm7 = vcmp.gt.f32.partialorder %v14_v17, 0.0  ;;  %v76_v30 = vld [vmem:[%s274_s1 + $0x20] sm:$0xff]  ;;  %v73_v31 = vld [vmem:[%s274_s1 + $0x8] sm:$0xff]  ;;  %v79_v32 = vld [vmem:[%s274_s1 + $0x38] sm:$0xff] }
   0x8   :  { %v39_v22 = vsel %vm23_vm6, %v15_v14, %v31_v19  ;;  %v77_v33 = vld [vmem:[%s274_s1 + $0x28] sm:$0xff]  ;;  %v74_v34 = vld [vmem:[%s274_s1 + $0x10] sm:$0xff] }
   0x9   :  { %61 = vmatpush.msra.mxu0 %v43_v12  ;;  %v38_v23 = vsel %vm22_vm7, %v14_v17, %v30_v21 }
   0xb   :  { %62 = vmatpush.msra.mxu0 %v42_v15 }
   0xd   :  { %63 = vmatpush.msra.mxu0 %v41_v18 }
   0xf   :  { %64 = vmatpush.msra.mxu0 %v40_v20 }
  0x11   :  { %65 = vmatpush.msra.mxu0 %v39_v22 }
  0x13   :  { %66 = vmatpush.msra.mxu0 %v38_v23 }
  0x14   :  { %158 = vmatmul.msk.f32.vlgmr.msra.gmra.mxu0 %vm47_vm8, %v46_v24 }
  0x91   :  { %v68_v25 = vpop.f32.mrf.mxu0 }
  0x92   :  { %v71_v26 = vmax.f32 %v68_v25, 0.0 }
  0x94   :  { %120 = vmatpush.msra.mxu1 %v71_v26  ;;  %167 = vmatpush.msra.mxu2 %v71_v26 }
  0x95   :  { %168 = vmatpush.msra.mxu3 %v71_v26  ;;  %162 = vmatmul.msk.f32.vlgmr.msra.gmra.mxu2 %vm80_vm9, %v75_v27 }
  0x96   :  { %159 = vmatmul.msk.f32.vlgmr.msra.gmra.mxu1 %vm80_vm9, %v72_v28  ;;  %165 = vmatmul.msk.f32.vlgmr.msra.gmra.mxu3 %vm80_vm9, %v78_v29 }
  0x9d   :  { %163 = vmatmul.msk.f32.gmra.mxu2 %vm80_vm9, %v76_v30 }
  0x9e   :  { %160 = vmatmul.msk.f32.gmra.mxu1 %vm80_vm9, %v73_v31  ;;  %166 = vmatmul.msk.f32.gmra.mxu3 %vm80_vm9, %v79_v32 }
  0xa5   :  { %164 = vmatmul.msk.f32.gmra.mxu2 %vm80_vm9, %v77_v33 }
  0xa6   :  { %161 = vmatmul.msk.f32.gmra.mxu1 %vm80_vm9, %v74_v34 }
 0x113   :  { %v122_v35 = vpop.f32.mrf.mxu1 }
 0x114   :  { %146 = vst [vmem:[%s275_s3] sm:$0xff] %v122_v35 }
 0x118   :  { %v131_v36 = vpop.f32.mrf.mxu2 }
 0x119   :  { %149 = vst [vmem:[%s275_s3 + $0x18] sm:$0xff] %v131_v36  ;;  %v140_v37 = vpop.f32.mrf.mxu3 }
 0x11a   :  { %152 = vst [vmem:[%s275_s3 + $0x30] sm:$0xff] %v140_v37 }
 0x11b   :  { %v125_v38 = vpop.f32.mrf.mxu1 }
 0x11c   :  { %147 = vst [vmem:[%s275_s3 + $0x8] sm:$0xff] %v125_v38 }
 0x120   :  { %v134_v39 = vpop.f32.mrf.mxu2 }
 0x121   :  { %150 = vst [vmem:[%s275_s3 + $0x20] sm:$0xff] %v134_v39  ;;  %v143_v40 = vpop.f32.mrf.mxu3 }
 0x122   :  { %153 = vst [vmem:[%s275_s3 + $0x38] sm:$0xff] %v143_v40 }
 0x123   :  { %v128_v41 = vpop.f32.mrf.mxu1 }
 0x124   :  { %148 = vst [vmem:[%s275_s3 + $0x10] sm:$0xff] %v128_v41 }
 0x128   :  { %v137_v42 = vpop.f32.mrf.mxu2 }
 0x129   :  { %151 = vst [vmem:[%s275_s3 + $0x28] sm:$0xff] %v137_v42 }

// kernel: unet_innermost_block.4
= control target key start
LH: loop header
LB: loop body
LE: loop exit
PB: predicated region body
PF: predicated region fallthrough
CT: control target
= control target key end

     0   :  { %s318_s9 = smov 0   ;;  %s320_s10 = smov 0   ;;  %s366_s0 = inlined_call_operand.vmem [shape: f32[2,4,256], index: 0, kind: input, shape index: {}]   ;;  %s367_s1 = inlined_call_operand.vmem [shape: f32[1,4,1], index: 1, kind: output, shape index: {0}]   ;;  %s368_s2 = inlined_call_operand.vmem [shape: f32[1,4,1], index: 2, kind: output, shape index: {1}]  }
   0x1   :  { %s322_s11 = smov 0  }
   0x2 LB: > { %s25_s12 = sadd.s32 1, %s296_s10  ;;  %p246_p0 = scmp.ge.s32.totalorder %s300_s11, 1  ;;  %s300_s11 = sphi %s322_s11, %s13_s11   ;;  %s296_s10 = sphi %s320_s10, %s370_s10   ;;  %s292_s9 = sphi %s318_s9, %s369_s9  }
   0x3   : > { %p27_p1 = scmp.ge.s32.totalorder %s25_s12, 2  ;;  %p124_p2 = scmp.lt.s32.totalorder %s300_s11, 3 }
   0x5   : > { %s372_s12 = smov (%p27_p1, %s25_s12), 0  ;;  %p125_p3 = pnand %p246_p0, %p124_p2 }
   0x6   : > { %p146_p4 = scmp.lt.s32.totalorder (!%p125_p3), %s292_s9, 1  ;;  %p249_p5 = scmp.ne.s32.totalorder (!%p125_p3), %s292_s9, 0 }
   0x7   : > { %128 = sbr.rel (%p125_p3) target bundleno = 160 (0xa0), region = 24 }
   0xc   : > { %s147_s13 = scalar_select %p146_p4, %s292_s9, 1 }
   0xd   : > { %159 = sbr.rel (%p249_p5) target bundleno = 21 (0x15), region = 28 }
   0xe   : > { %s252_s14 = sshll.u32 %s147_s13, 3 }
   0xf   : > { %s153_s17 = scalar_lea.vmem %s366_s0, %s252_s14 }
  0x12   : > { %vm160_vm0 = vcmask 3072   ;;  %v302_v0 = vmov 0.0  }
  0x13   : > { %161 = vst.msk [vmem:[%s367_s1] sm:$0xf] %vm160_vm0, %v302_v0 }
  0x14   : > { %162 = vst.msk [vmem:[%s368_s2] sm:$0xf] %vm160_vm0, %v302_v0 }
  0x15 PF: > { %v163_v1 = vld [vmem:[%s153_s17] sm:$0xff]  ;;  %vm171_vm1 = vcmask 1043456   ;;  %vm178_vm2 = vcmask 3072  }
  0x16   : > { %166 = vst [vmem:[#allocation1] ss:$2 sm:$0xff] %v163_v1  ;;  %v181_v2 = vmul.f32 %v163_v1, %v163_v1 }
  0x1a   : > { %v164_v13 = vld [vmem:[%s367_s1] sm:$0xf] }
  0x1b   : > { %v180_v16 = vld [vmem:[%s368_s2] sm:$0xf] }
  0x1d   : > { %v167_v3 = vld.sshfl [vmem:[#allocation1] sm:$0xff pattern:$0x75316420]  ;;  %v168_v4 = vld.sshfl [vmem:[#allocation1 + $0x8] sm:$0xff pattern:$0x75316420] }
  0x1e   : > { %v172_v5 = vsel %vm171_vm1, %v167_v3, 0.0  ;;  %v173_v6 = vsel %vm171_vm1, %v168_v4, 0.0  ;;  %183 = vst [vmem:[#allocation1] ss:$2 sm:$0xff] %v181_v2 }
  0x1f   : > { %v174_v7 = vadd.f32 %v173_v6, %v172_v5 }
  0x21   : > { %175 = vadd.xlane.f32.xlu0 %v174_v7 }
  0x25   : > { %v184_v8 = vld.sshfl [vmem:[#allocation1] sm:$0xff pattern:$0x75316420]  ;;  %v185_v9 = vld.sshfl [vmem:[#allocation1 + $0x8] sm:$0xff pattern:$0x75316420] }
  0x26   : > { %v188_v10 = vsel %vm171_vm1, %v184_v8, 0.0  ;;  %v189_v11 = vsel %vm171_vm1, %v185_v9, 0.0 }
  0x27   : > { %v190_v12 = vadd.f32 %v189_v11, %v188_v10 }
  0x29   : > { %191 = vadd.xlane.f32.xlu0 %v190_v12 }
  0x94   : > { %v176_v14 = vpop.xlane.xlu0 %175 }
  0x95   : > { %v177_v15 = vadd.f32 %v176_v14, %v164_v13 }
  0x97   : > { %179 = vst.msk [vmem:[%s367_s1] sm:$0xf] %vm178_vm2, %v177_v15 }
  0x9c   : > { %v192_v17 = vpop.xlane.xlu0 %191 }
  0x9d   : > { %v193_v18 = vadd.f32 %v192_v17, %v180_v16 }
  0x9f   : > { %194 = vst.msk [vmem:[%s368_s2] sm:$0xf] %vm178_vm2, %v193_v18 }
  0xa0 PF: > { %s13_s11 = sadd.s32 1, %s300_s11   ;;  %s369_s9 = smov %s296_s10 }
  0xa1   : > { %p10_p6 = scmp.ge.s32.totalorder %s13_s11, 4   ;;  %s370_s10 = smov %s372_s12 }
  0xa3   :  { %12 = sbr.rel (!%p10_p6) target bundleno = 2 (0x2), region = 62 }

// kernel: unet_innermost_block.5
= control target key start
LH: loop header
LB: loop body
LE: loop exit
PB: predicated region body
PF: predicated region fallthrough
CT: control target
= control target key end

     0   :  { %s407_s12 = smov 0   ;;  %s409_s13 = smov 0   ;;  %s443_s0 = inlined_call_operand.vmem [shape: f32[2,4,256], index: 0, kind: input, shape index: {}]   ;;  %s444_s1 = inlined_call_operand.vmem [shape: f32[1,4,1], index: 1, kind: input, shape index: {}]   ;;  %s445_s2 = inlined_call_operand.vmem [shape: f32[1,4,1], index: 2, kind: input, shape index: {}]   ;;  %s446_s3 = inlined_call_operand.vmem [shape: f32[2,4,256], index: 3, kind: output, shape index: {}]  }
   0x1   :  { %s411_s14 = smov 0  }
   0x2 LB: > { %s25_s15 = sadd.s32 1, %s379_s13  ;;  %p325_p0 = scmp.ge.s32.totalorder %s383_s14, 1  ;;  %s383_s14 = sphi %s411_s14, %s13_s14   ;;  %s379_s13 = sphi %s409_s13, %s448_s13   ;;  %s375_s12 = sphi %s407_s12, %s447_s12  }
   0x3   : > { %p27_p1 = scmp.ge.s32.totalorder %s25_s15, 2  ;;  %p158_p2 = scmp.lt.s32.totalorder %s383_s14, 3 }
   0x5   : > { %s450_s15 = smov (%p27_p1, %s25_s15), 0  ;;  %p159_p3 = pnand %p325_p0, %p158_p2 }
   0x6   : > { %p191_p4 = scmp.lt.s32.totalorder (!%p159_p3), %s375_s12, 1 }
   0x7   : > { %162 = sbr.rel (%p159_p3) target bundleno = 142 (0x8e), region = 32 }
   0xc   : > { %v211_v0 = vld [vmem:[%s444_s1] sm:$0xf]  ;;  %v385_v1 = vmov 0   ;;  %s452_s12 = smov (!%p191_p4, %s375_s12), 1  ;;  %v386_v3 = vmov 839922192  }
   0xd   : > { %360 = vset.pattern.permute.xlu0 %v385_v1  ;;  %v222_v2 = vld [vmem:[%s445_s2] sm:$0xf]  ;;  %v217_v4 = vunpack.c.l.s4 %v386_v3  ;;  %s332_s20 = sshll.u32 %s452_s12, 3 }
   0xe   : > { %214 = vperm.xlu0 %360, %v211_v0   ;;  %s198_s23 = scalar_lea.vmem %s443_s0, %s332_s20  ;;  %s208_s26 = scalar_lea.vmem %s446_s3, %s332_s20 }
   0xf   : > { %v218_v6 = vunpack.c.0.s8 %v217_v4  ;;  %v210_v8 = vld [vmem:[%s198_s23] sm:$0xff] }
  0x16   : > { %225 = vperm.xlu0 %360, %v222_v2  }
  0x80   : > { %v215_v5 = vpop.permute.xlu0 %214 }
  0x81   : > { %v219_v7 = vperm.slane %v215_v5, %v218_v6 }
  0x83   : > { %v221_v10 = vmul.f32 %v219_v7, %v210_v8 }
  0x88   : > { %v226_v9 = vpop.permute.xlu0 %225 }
  0x89   : > { %v230_v11 = vperm.slane %v226_v9, %v218_v6 }
  0x8b   : > { %v232_v12 = vadd.f32 %v230_v11, %v221_v10 }
  0x8d   : > { %233 = vst [vmem:[%s208_s26] sm:$0xff] %v232_v12 }
  0x8e PF: > { %s13_s14 = sadd.s32 1, %s383_s14   ;;  %s447_s12 = smov %s379_s13 }
  0x8f   : > { %p10_p5 = scmp.ge.s32.totalorder %s13_s14, 4   ;;  %s448_s13 = smov %s450_s15 }
  0x91   :  { %12 = sbr.rel (!%p10_p5) target bundleno = 2 (0x2), region = 62 }

</bundles_post_ra>
